<compile_context>
chip_gen: v6e
topology: v6e:2x2x1
jax: 0.10.0
libtpu: 0.0.40
codegen_flags: <defaults>
</compile_context>

<pallas_src>
import jax
import jax.numpy as jnp
from jax.experimental import pallas as pl
from jax.experimental.pallas import tpu as pltpu

H1, H2 = 256, 128      # hidden widths from the PyTorch module
LANE = 128             # TPU lane width


def _round_up(x, m):
    return (x + m - 1) // m * m


def _choose_tile_b(B):
    """Adaptive batch tile.

    Small B: a single step with minimal padding (multiple of 16 so bf16
    intermediates pack cleanly on sublanes).  Large B: big tiles to amortize
    per-step pipeline overhead, capped at ~half the (padded) batch so the grid
    has >= 2 'parallel' steps (keeps both v7x TensorCores busy) and at 1024
    rows (per-tile VMEM stays < ~3 MiB on every generation).
    """
    b16 = _round_up(max(B, 16), 16)
    if b16 <= 256:
        return b16
    half = _round_up((b16 + 1) // 2, 16)
    return min(1024, half)


def qnetwork_kernel(x_ref, w1_ref, b1_ref, w2_ref, b2_ref, w3_ref, b3_ref, o_ref):
    # In-kernel bf16 cast of x (saves a separate wrapper-side XLA pass).
    x = x_ref[...].astype(jnp.bfloat16)
    # fc1 + relu  (bf16 operands, f32 MXU accumulation; bias/activation in f32)
    h1 = jnp.dot(x, w1_ref[...], preferred_element_type=jnp.float32)
    h1 = jnp.maximum(h1 + b1_ref[...], 0.0)
    # fc2 + relu
    h2 = jnp.dot(h1.astype(jnp.bfloat16), w2_ref[...],
                 preferred_element_type=jnp.float32)
    h2 = jnp.maximum(h2 + b2_ref[...], 0.0)
    # fc3 (output column-padded to a lane-dense 128-wide slab; no activation)
    out = jnp.dot(h2.astype(jnp.bfloat16), w3_ref[...],
                  preferred_element_type=jnp.float32)
    o_ref[...] = (out + b3_ref[...]).astype(o_ref.dtype)


def qnetwork_forward(x, params, *, tile_b=None, out_dtype=jnp.float32):
    """x: [B, state_size] float32. params: dict of f32 w1,b1,w2,b2,w3,b3.

    out_dtype=jnp.bfloat16 halves the dominant HBM writeback stream for large
    batches; default f32 preserves Q-value argmax precision.
    """
    w1, b1 = params["w1"], params["b1"]
    w2, b2 = params["w2"], params["b2"]
    w3, b3 = params["w3"], params["b3"]

    B, state_size = x.shape
    action_size = w3.shape[1]
    out_pad = _round_up(action_size, LANE)          # lane-dense output width
    if tile_b is None:
        tile_b = _choose_tile_b(B)
    b_pad = _round_up(B, tile_b)

    # Only pad x when the batch is not tile-aligned (the bf16 cast happens
    # in-kernel, so no extra full-array pass here in the aligned case).
    x_p = x if b_pad == B else (
        jnp.zeros((b_pad, state_size), x.dtype).at[:B].set(x))

    # bf16 weights halve the (one-shot) weight DMA; biases stay f32.
    w1_c = w1.astype(jnp.bfloat16)
    w2_c = w2.astype(jnp.bfloat16)
    w3_p = jnp.zeros((H2, out_pad), jnp.bfloat16).at[:, :action_size].set(
        w3.astype(jnp.bfloat16))
    b3_p = jnp.zeros((1, out_pad), jnp.float32).at[:, :action_size].set(b3)

    grid = (b_pad // tile_b,)

    def const_spec(a):
        # Full-array block with a constant index_map: fetched once, then
        # VMEM-resident across all grid steps.
        return pl.BlockSpec(a.shape, lambda i: (0,) * a.ndim)

    out = pl.pallas_call(
        qnetwork_kernel,
        out_shape=jax.ShapeDtypeStruct((b_pad, out_pad), out_dtype),
        grid=grid,
        in_specs=[
            pl.BlockSpec((tile_b, state_size), lambda i: (i, 0)),  # x streams
            const_spec(w1_c), const_spec(b1),
            const_spec(w2_c), const_spec(b2),
            const_spec(w3_p), const_spec(b3_p),
        ],
        out_specs=pl.BlockSpec((tile_b, out_pad), lambda i: (i, 0)),
        compiler_params=pltpu.CompilerParams(
            dimension_semantics=("parallel",)),
    )(x_p, w1_c, b1, w2_c, b2, w3_p, b3_p)

    # Slice off column/batch padding; fuses away under the caller's jit.
    return out[:B, :action_size]


def init_params(key, state_size, action_size):
    """Deterministic init mimicking nn.Linear's U(-1/sqrt(fan_in), 1/sqrt(fan_in))."""
    dims = [(state_size, H1), (H1, H2), (H2, action_size)]
    params = {}
    keys = jax.random.split(key, 2 * len(dims))
    for i, (fan_in, fan_out) in enumerate(dims):
        bound = 1.0 / jnp.sqrt(float(fan_in))
        w = jax.random.uniform(keys[2 * i], (fan_in, fan_out), jnp.float32, -bound, bound)
        b = jax.random.uniform(keys[2 * i + 1], (1, fan_out), jnp.float32, -bound, bound)
        params[f"w{i + 1}"] = w
        params[f"b{i + 1}"] = b
    return params


def qnetwork_reference(x, params):
    """Pure-JAX reference with the same bf16-input / f32-accumulate semantics."""
    w1 = params["w1"].astype(jnp.bfloat16)
    w2 = params["w2"].astype(jnp.bfloat16)
    w3 = params["w3"].astype(jnp.bfloat16)
    h1 = jnp.maximum(
        jnp.dot(x.astype(jnp.bfloat16), w1, preferred_element_type=jnp.float32)
        + params["b1"], 0.0)
    h2 = jnp.maximum(
        jnp.dot(h1.astype(jnp.bfloat16), w2, preferred_element_type=jnp.float32)
        + params["b2"], 0.0)
    return (jnp.dot(h2.astype(jnp.bfloat16), w3, preferred_element_type=jnp.float32)
            + params["b3"])


if __name__ == "__main__":
    key = jax.random.PRNGKey(0)
    k_params, k_x = jax.random.split(key)

    state_size = 16   # small synthetic state dim
    action_size = 4   # small synthetic action dim
    batch = 8

    params = init_params(k_params, state_size, action_size)
    x = jax.random.normal(k_x, (batch, state_size), jnp.float32)

    # jit the whole forward so the pad / lane-pad slice fuse around the kernel.
    fwd = jax.jit(qnetwork_forward)
    out = jax.block_until_ready(fwd(x, params))

    ref = qnetwork_reference(x, params)
    assert out.shape == (batch, action_size)
    assert jnp.allclose(out, ref, atol=1e-3, rtol=1e-3), "mismatch vs reference"

    # TODO(synk): at B~8 per env step, fusing this MLP into a larger acting /
    # replay-batch kernel (or plain XLA dots) amortizes weight DMA better than
    # a standalone pallas_call.
    print("KERNEL_OK")
</pallas_src>

<mosaic_0001>
module attributes {stable_mosaic.version = 11 : i64} {
  func.func @qnetwork_kernel(%arg0: i32, %arg1: memref<16x16xf32, #tpu.memory_space<vmem>>, %arg2: memref<16x256xbf16, #tpu.memory_space<vmem>>, %arg3: memref<1x256xf32, #tpu.memory_space<vmem>>, %arg4: memref<256x128xbf16, #tpu.memory_space<vmem>>, %arg5: memref<1x128xf32, #tpu.memory_space<vmem>>, %arg6: memref<128x128xbf16, #tpu.memory_space<vmem>>, %arg7: memref<1x128xf32, #tpu.memory_space<vmem>>, %arg8: memref<16x128xf32, #tpu.memory_space<vmem>>) attributes {dimension_semantics = [#tpu.dimension_semantics<parallel>], iteration_bounds = array<i64: 1>, scalar_prefetch = 0 : i64, scratch_operands = 0 : i64, tpu.core_type = #tpu.core_type<tc>, window_params = [{transform_indices = @transform_0, window_bounds = array<i64: 16, 16>}, {pipeline_mode = #tpu.pipeline_mode<synchronous>, transform_indices = @transform_1, window_bounds = array<i64: 16, 256>}, {pipeline_mode = #tpu.pipeline_mode<synchronous>, transform_indices = @transform_2, window_bounds = array<i64: 1, 256>}, {pipeline_mode = #tpu.pipeline_mode<synchronous>, transform_indices = @transform_3, window_bounds = array<i64: 256, 128>}, {pipeline_mode = #tpu.pipeline_mode<synchronous>, transform_indices = @transform_4, window_bounds = array<i64: 1, 128>}, {pipeline_mode = #tpu.pipeline_mode<synchronous>, transform_indices = @transform_5, window_bounds = array<i64: 128, 128>}, {pipeline_mode = #tpu.pipeline_mode<synchronous>, transform_indices = @transform_6, window_bounds = array<i64: 1, 128>}, {transform_indices = @transform_7, window_bounds = array<i64: 16, 128>}]} {
    %c0 = arith.constant 0 : index
    %c0_0 = arith.constant 0 : index
    %0 = vector.load %arg1[%c0, %c0_0] : memref<16x16xf32, #tpu.memory_space<vmem>>, vector<16x16xf32>
    %1 = arith.truncf %0 : vector<16x16xf32> to vector<16x16xbf16>
    %c0_1 = arith.constant 0 : index
    %c0_2 = arith.constant 0 : index
    %2 = vector.load %arg2[%c0_1, %c0_2] : memref<16x256xbf16, #tpu.memory_space<vmem>>, vector<16x256xbf16>
    %cst = arith.constant dense<0.000000e+00> : vector<16x256xf32>
    %3 = tpu.matmul %1, %2, %cst {dimension_numbers = #tpu.dot_dimension_numbers<[1], [0], [0], [1], [0, 0, 1, 1], [], []>} : vector<16x16xbf16>, vector<16x256xbf16>, vector<16x256xf32> -> vector<16x256xf32>
    %c0_3 = arith.constant 0 : index
    %c0_4 = arith.constant 0 : index
    %4 = vector.load %arg3[%c0_3, %c0_4] : memref<1x256xf32, #tpu.memory_space<vmem>>, vector<1x256xf32>
    %5 = vector.broadcast %4 : vector<1x256xf32> to vector<16x256xf32>
    %6 = arith.addf %3, %5 : vector<16x256xf32>
    %cst_5 = arith.constant 0.000000e+00 : f32
    %7 = vector.broadcast %cst_5 : f32 to vector<16x256xf32>
    %8 = arith.maximumf %6, %7 : vector<16x256xf32>
    %9 = arith.truncf %8 : vector<16x256xf32> to vector<16x256xbf16>
    %c0_6 = arith.constant 0 : index
    %c0_7 = arith.constant 0 : index
    %10 = vector.load %arg4[%c0_6, %c0_7] : memref<256x128xbf16, #tpu.memory_space<vmem>>, vector<256x128xbf16>
    %cst_8 = arith.constant dense<0.000000e+00> : vector<16x128xf32>
    %11 = tpu.matmul %9, %10, %cst_8 {dimension_numbers = #tpu.dot_dimension_numbers<[1], [0], [0], [1], [0, 0, 1, 1], [], []>} : vector<16x256xbf16>, vector<256x128xbf16>, vector<16x128xf32> -> vector<16x128xf32>
    %c0_9 = arith.constant 0 : index
    %c0_10 = arith.constant 0 : index
    %12 = vector.load %arg5[%c0_9, %c0_10] : memref<1x128xf32, #tpu.memory_space<vmem>>, vector<1x128xf32>
    %13 = vector.broadcast %12 : vector<1x128xf32> to vector<16x128xf32>
    %14 = arith.addf %11, %13 : vector<16x128xf32>
    %cst_11 = arith.constant 0.000000e+00 : f32
    %15 = vector.broadcast %cst_11 : f32 to vector<16x128xf32>
    %16 = arith.maximumf %14, %15 : vector<16x128xf32>
    %17 = arith.truncf %16 : vector<16x128xf32> to vector<16x128xbf16>
    %c0_12 = arith.constant 0 : index
    %c0_13 = arith.constant 0 : index
    %18 = vector.load %arg6[%c0_12, %c0_13] : memref<128x128xbf16, #tpu.memory_space<vmem>>, vector<128x128xbf16>
    %cst_14 = arith.constant dense<0.000000e+00> : vector<16x128xf32>
    %19 = tpu.matmul %17, %18, %cst_14 {dimension_numbers = #tpu.dot_dimension_numbers<[1], [0], [0], [1], [0, 0, 1, 1], [], []>} : vector<16x128xbf16>, vector<128x128xbf16>, vector<16x128xf32> -> vector<16x128xf32>
    %c0_15 = arith.constant 0 : index
    %c0_16 = arith.constant 0 : index
    %20 = vector.load %arg7[%c0_15, %c0_16] : memref<1x128xf32, #tpu.memory_space<vmem>>, vector<1x128xf32>
    %21 = vector.broadcast %20 : vector<1x128xf32> to vector<16x128xf32>
    %22 = arith.addf %19, %21 : vector<16x128xf32>
    %c0_17 = arith.constant 0 : index
    %c0_18 = arith.constant 0 : index
    %23 = vector.load %arg8[%c0_17, %c0_18] : memref<16x128xf32, #tpu.memory_space<vmem>>, vector<16x128xf32>
    tpu.vector_store %arg8[%c0_17, %c0_18], %22 {strides = array<i32>} : memref<16x128xf32, #tpu.memory_space<vmem>>, vector<16x128xf32>,
    return
  }
  func.func @transform_0(%arg0: i32) -> (i32, i32) {
    %c0_i32 = arith.constant 0 : i32
    %c0_i32_0 = arith.constant 0 : i32
    return %arg0, %c0_i32 : i32, i32
  }
  func.func @transform_1(%arg0: i32) -> (i32, i32) {
    %c0_i32 = arith.constant 0 : i32
    %c0_i32_0 = arith.constant 0 : i32
    %c0_i32_1 = arith.constant 0 : i32
    return %c0_i32, %c0_i32_0 : i32, i32
  }
  func.func @transform_2(%arg0: i32) -> (i32, i32) {
    %c0_i32 = arith.constant 0 : i32
    %c0_i32_0 = arith.constant 0 : i32
    %c0_i32_1 = arith.constant 0 : i32
    return %c0_i32, %c0_i32_0 : i32, i32
  }
  func.func @transform_3(%arg0: i32) -> (i32, i32) {
    %c0_i32 = arith.constant 0 : i32
    %c0_i32_0 = arith.constant 0 : i32
    %c0_i32_1 = arith.constant 0 : i32
    return %c0_i32, %c0_i32_0 : i32, i32
  }
  func.func @transform_4(%arg0: i32) -> (i32, i32) {
    %c0_i32 = arith.constant 0 : i32
    %c0_i32_0 = arith.constant 0 : i32
    %c0_i32_1 = arith.constant 0 : i32
    return %c0_i32, %c0_i32_0 : i32, i32
  }
  func.func @transform_5(%arg0: i32) -> (i32, i32) {
    %c0_i32 = arith.constant 0 : i32
    %c0_i32_0 = arith.constant 0 : i32
    %c0_i32_1 = arith.constant 0 : i32
    return %c0_i32, %c0_i32_0 : i32, i32
  }
  func.func @transform_6(%arg0: i32) -> (i32, i32) {
    %c0_i32 = arith.constant 0 : i32
    %c0_i32_0 = arith.constant 0 : i32
    %c0_i32_1 = arith.constant 0 : i32
    return %c0_i32, %c0_i32_0 : i32, i32
  }
  func.func @transform_7(%arg0: i32) -> (i32, i32) {
    %c0_i32 = arith.constant 0 : i32
    %c0_i32_0 = arith.constant 0 : i32
    return %arg0, %c0_i32 : i32, i32
  }
}

</mosaic_0001>

<bundles_post_ra>
// kernel: qnetwork_forward.1
= control target key start
LH: loop header
LB: loop body
LE: loop exit
PB: predicated region body
PF: predicated region fallthrough
CT: control target
= control target key end

     0   :  { %v514_v1 = vmov 0   ;;  %vm54_vm0 = vcmask 130048   ;;  %v515_v22 = vmov 0.0   ;;  %v34_v27 = vlaneseq  ;;  %s656_s1 = inlined_call_operand.vmem [shape: bf16[16,256], index: 1, kind: input, shape index: {}]   ;;  %s657_s0 = inlined_call_operand.vmem [shape: f32[16,16], index: 0, kind: input, shape index: {}]   ;;  %s658_s3 = inlined_call_operand.vmem [shape: bf16[256,128], index: 3, kind: input, shape index: {}]   ;;  %s659_s5 = inlined_call_operand.vmem [shape: bf16[128,128], index: 5, kind: input, shape index: {}]   ;;  %s660_s2 = inlined_call_operand.vmem [shape: f32[1,256], index: 2, kind: input, shape index: {}]   ;;  %s661_s4 = inlined_call_operand.vmem [shape: f32[1,128], index: 4, kind: input, shape index: {}]   ;;  %s662_s6 = inlined_call_operand.vmem [shape: f32[1,128], index: 6, kind: input, shape index: {}]   ;;  %s663_s7 = inlined_call_operand.vmem [shape: f32[16,128], index: 7, kind: output, shape index: {}]  }
   0x1   :  { %v487_v0 = vld [vmem:[%s656_s1 + $0x4] ss:$8 sps:$4 sm:$0xff]   ;;  %90 = vmatprep.mubr.bf16.mxu0 %v514_v1  ;;  %v489_v2 = vld [vmem:[%s656_s1] ss:$8 sps:$4 sm:$0xff]   ;;  %v490_v6 = vld [vmem:[%s658_s3 + $0x78] sm:$0xff]   ;;  %vm516_vm1 = vmmov 0  }
   0x2   :  { %v27_v3 = vld [vmem:[%s657_s0] sm:$0xff]  ;;  %v28_v4 = vld [vmem:[%s657_s0 + $0x8] sm:$0xff]  ;;  %72 = vmatprep.subr.bf16.mxu0 %v487_v0  ;;  %v491_v7 = vld [vmem:[%s658_s3 + $0x38] sm:$0xff]   ;;  %433 = vmatprep.subr.bf16.mxu1 %v490_v6  ;;  %v35_v28 = vshrl.u32 %v34_v27, 7 }
   0x3   :  { %v29_v5 = vpack.c.bf16 %v28_v4, %v27_v3  ;;  %73 = vmatpush1.bf16.msra.mxu0 %v489_v2  ;;  %v492_v8 = vld [vmem:[%s658_s3 + $0x70] sm:$0xff]   ;;  %434 = vmatpush3.bf16.msra.mxu1 %v491_v7  ;;  %v494_v10 = vld [vmem:[%s658_s3 + $0x68] sm:$0xff]   ;;  %v496_v12 = vld [vmem:[%s658_s3 + $0x60] sm:$0xff]  }
   0x4   :  { %v493_v9 = vld [vmem:[%s658_s3 + $0x30] sm:$0xff]   ;;  %435 = vmatprep.subr.bf16.mxu1 %v492_v8  ;;  %v495_v11 = vld [vmem:[%s658_s3 + $0x28] sm:$0xff]   ;;  %v497_v13 = vld [vmem:[%s658_s3 + $0x20] sm:$0xff]   ;;  %464 = vmatprep.subr.bf16.mxu0 %v515_v22  ;;  %v40_v29 = vsub.s32 1, %v35_v28  ;;  %v36_v30 = vsub.s32 0, %v35_v28 }
   0x5   :  { %v498_v14 = vld [vmem:[%s658_s3 + $0x58] sm:$0xff]   ;;  %v500_v16 = vld [vmem:[%s658_s3 + $0x50] sm:$0xff]   ;;  %v502_v18 = vld [vmem:[%s658_s3 + $0x48] sm:$0xff]  }
   0x6   :  { %406 = vmatmul.mubr.msk.bf16.vlgmr.msra.gmra.mxu0 %vm54_vm0, %v29_v5  ;;  %v499_v15 = vld [vmem:[%s658_s3 + $0x18] sm:$0xff]   ;;  %v501_v17 = vld [vmem:[%s658_s3 + $0x10] sm:$0xff]   ;;  %v503_v19 = vld [vmem:[%s658_s3 + $0x8] sm:$0xff]  }
   0x7   :  { %436 = vmatpush3.bf16.msra.mxu1 %v493_v9  ;;  %v504_v20 = vld [vmem:[%s658_s3 + $0x40] sm:$0xff]   ;;  %v506_v23 = vld [vmem:[%s659_s5 + $0x38] sm:$0xff]   ;;  %v507_v24 = vld [vmem:[%s659_s5 + $0x30] sm:$0xff]   ;;  %480 = vmatprep.mubr.msk.bf16.mxu0 %vm516_vm1, %v515_v22 }
   0x8   :  { %437 = vmatprep.subr.bf16.mxu1 %v494_v10  ;;  %v505_v21 = vld [vmem:[%s658_s3] sm:$0xff]   ;;  %465 = vmatpush3.bf16.msra.mxu0 %v506_v23  ;;  %v508_v25 = vld [vmem:[%s659_s5 + $0x28] sm:$0xff]   ;;  %v510_v48 = vld [vmem:[%s659_s5 + $0x18] sm:$0xff]  }
   0x9   :  { %466 = vmatprep.subr.bf16.mxu0 %v515_v22  ;;  %v509_v26 = vld [vmem:[%s659_s5 + $0x20] sm:$0xff]   ;;  %v511_v49 = vld [vmem:[%s659_s5 + $0x10] sm:$0xff]   ;;  %v512_v50 = vld [vmem:[%s659_s5 + $0x8] sm:$0xff]  }
   0xa   :  { %v32_v31 = vld [vmem:[%s660_s2] sm:$0x3] }
   0xb   :  { %438 = vmatpush3.bf16.msra.mxu1 %v495_v11  ;;  %v41_v33 = vrot.slane %v32_v31, %v40_v29  ;;  %v37_v34 = vrot.slane %v32_v31, %v36_v30  ;;  %v513_v51 = vld [vmem:[%s659_s5] sm:$0xff]  }
   0xc   :  { %439 = vmatprep.subr.bf16.mxu1 %v496_v12  ;;  %467 = vmatpush3.bf16.msra.mxu0 %v507_v24  ;;  %v407_v55 = vld [vmem:[%s661_s4] ss:$0 sm:$0xff] }
   0xd   :  { %468 = vmatprep.subr.bf16.mxu0 %v515_v22  ;;  %v424_v0 = vld [vmem:[%s662_s6] ss:$0 sm:$0xff] }
   0xf   :  { %440 = vmatpush3.bf16.msra.mxu1 %v497_v13 }
  0x10   :  { %441 = vmatprep.subr.bf16.mxu1 %v498_v14  ;;  %469 = vmatpush3.bf16.msra.mxu0 %v508_v25 }
  0x11   :  { %470 = vmatprep.subr.bf16.mxu0 %v515_v22 }
  0x13   :  { %442 = vmatpush3.bf16.msra.mxu1 %v499_v15 }
  0x14   :  { %443 = vmatprep.subr.bf16.mxu1 %v500_v16  ;;  %471 = vmatpush3.bf16.msra.mxu0 %v509_v26 }
  0x15   :  { %472 = vmatprep.subr.bf16.mxu0 %v515_v22 }
  0x17   :  { %444 = vmatpush3.bf16.msra.mxu1 %v501_v17 }
  0x18   :  { %445 = vmatprep.subr.bf16.mxu1 %v502_v18  ;;  %473 = vmatpush3.bf16.msra.mxu0 %v510_v48 }
  0x19   :  { %474 = vmatprep.subr.bf16.mxu0 %v515_v22 }
  0x1b   :  { %446 = vmatpush3.bf16.msra.mxu1 %v503_v19 }
  0x1c   :  { %447 = vmatprep.subr.bf16.mxu1 %v504_v20  ;;  %475 = vmatpush3.bf16.msra.mxu0 %v511_v49 }
  0x1d   :  { %476 = vmatprep.subr.bf16.mxu0 %v515_v22 }
  0x1f   :  { %448 = vmatpush3.bf16.msra.mxu1 %v505_v21 }
  0x20   :  { %477 = vmatpush3.bf16.msra.mxu0 %v512_v50 }
  0x21   :  { %478 = vmatprep.subr.bf16.mxu0 %v515_v22 }
  0x24   :  { %479 = vmatpush3.bf16.msra.mxu0 %v513_v51 }
  0xc6   :  { %v92_v32 = vpop.f32.mrf.mxu0 }
  0xc7   :  { %v93_v39 = vadd.f32 %v92_v32, %v37_v34 }
  0xc8   :  { %v94_v35 = vpop.f32.mrf.mxu0 }
  0xc9   :  { %v95_v37 = vadd.f32 %v94_v35, %v41_v33  ;;  %v101_v45 = vmax.f32 %v93_v39, 0.0 }
  0xca   :  { %v96_v36 = vpop.f32.mrf.mxu0 }
  0xcb   :  { %v97_v38 = vadd.f32 %v96_v36, %v37_v34  ;;  %v102_v43 = vmax.f32 %v95_v37, 0.0 }
  0xcc   :  { %v98_v40 = vpop.f32.mrf.mxu0 }
  0xcd   :  { %v99_v41 = vadd.f32 %v98_v40, %v41_v33  ;;  %v103_v42 = vmax.f32 %v97_v38, 0.0 }
  0xcf   :  { %v104_v44 = vmax.f32 %v99_v41, 0.0  ;;  %v105_v47 = vpack.c.bf16 %v103_v42, %v101_v45 }
  0xd1   :  { %v106_v46 = vpack.c.bf16 %v104_v44, %v102_v43 }
  0xd3   :  { %274 = vmatprep.mubr.bf16.mxu1 %v106_v46 }
  0xd4   :  { %275 = vmatmul.mubr.bf16.vlgmr.msra.gmra.mxu1 %v105_v47 }
 0x194   :  { %v449_v52 = vpop.f32.mrf.mxu1 }
 0x196   :  { %v450_v53 = vpop.f32.mrf.mxu1 }
 0x197   :  { %v451_v54 = vadd.f32 %v450_v53, %v449_v52 }
 0x198   :  { %v452_v56 = vpop.f32.mrf.mxu1 }
 0x199   :  { %v277_v58 = vadd.f32 %v451_v54, %v407_v55 }
 0x19a   :  { %v453_v57 = vpop.f32.mrf.mxu1 }
 0x19b   :  { %v454_v59 = vadd.f32 %v453_v57, %v452_v56  ;;  %v283_v61 = vmax.f32 %v277_v58, 0.0 }
 0x19d   :  { %v280_v60 = vadd.f32 %v454_v59, %v407_v55 }
 0x19f   :  { %v284_v62 = vmax.f32 %v280_v60, 0.0 }
 0x1a1   :  { %v285_v63 = vpack.c.bf16 %v284_v62, %v283_v61 }
 0x1a3   :  { %481 = vmatmul.mubr.bf16.vlgmr.msra.gmra.mxu0 %v285_v63 }
 0x263   :  { %v391_v1 = vpop.f32.mrf.mxu0 }
 0x264   :  { %v392_v2 = vadd.f32 %v424_v0, %v391_v1 }
 0x265   :  { %v482_v3 = vpop.f32.mrf.mxu0 }
 0x266   :  { %398 = vst [vmem:[%s663_s7] sm:$0xff] %v392_v2 }
 0x267   :  { %v394_v4 = vpop.f32.mrf.mxu0 }
 0x268   :  { %v395_v5 = vadd.f32 %v424_v0, %v394_v4 }
 0x269   :  { %v483_v6 = vpop.f32.mrf.mxu0 }
 0x26a   :  { %399 = vst [vmem:[%s663_s7 + $0x8] sm:$0xff] %v395_v5 }

</bundles_post_ra>
